<compile_context>
chip_gen: v7x
topology: tpu7x:2x2x1
jax: 0.10.0
libtpu: 0.0.40
codegen_flags: <defaults>
</compile_context>

<pallas_src>
import functools

import jax
import jax.numpy as jnp
from jax import lax
from jax.experimental import pallas as pl
from jax.experimental.pallas import tpu as pltpu


def _balscl_kernel(tgtr_ref, den_ref, tgtc_ref, r0_ref, r1_ref, q_ref, kt_ref,
                   out_ref, m_ref, l_ref, sml_ref):
    i = pl.program_id(0)            # B-tile index   ("parallel")
    k = pl.program_id(1)            # N-tile index   ("arbitrary", reduction)
    nk = pl.num_programs(1)
    tb = q_ref.shape[0]
    tn = kt_ref.shape[1]
    n_groups = tn // 128            # number of 128-wide lane groups per tile

    @pl.when(k == 0)
    def _init():
        # m starts at 0: equivalent to a phantom column with logit 0 and weight 0
        # (the shift cancels exactly in the final formula), so no -inf handling.
        m_ref[...] = jnp.zeros((tb, 128), jnp.float32)
        l_ref[...] = jnp.zeros((tb, 128), jnp.float32)
        sml_ref[...] = jnp.zeros((tb, 128), jnp.float32)

    # Logits tile: bf16 MXU matmul with f32 accumulation.  1/temperature is already
    # folded into q on the host side, so no per-element scale here.
    logits = jnp.dot(q_ref[...], kt_ref[...],
                     preferred_element_type=jnp.float32)            # (tb, tn) f32

    row_t = tgtr_ref[...]                                           # (tb, 1) int32
    # Global row / column ids, only needed for the self-column exclusion.
    row_gid = i * tb + lax.broadcasted_iota(jnp.int32, (tb, 1), 0)  # (tb, 1)
    lane = lax.broadcasted_iota(jnp.int32, (1, 128), 1)             # (1, 128)
    col_base = k * tn

    # ---- Pass 1: per-lane running max over the lane groups (VALU only). ----
    tile_max = logits[:, 0:128]
    for g in range(1, n_groups):
        tile_max = jnp.maximum(tile_max, logits[:, g * 128:(g + 1) * 128])
    m_prev = m_ref[...]
    m_new = jnp.maximum(m_prev, tile_max)                           # (tb, 128)
    alpha = jnp.exp(m_prev - m_new)

    # ---- Pass 2: weighted exp-sum and sum(mask*logits), per lane group. ----
    l_acc = jnp.zeros((tb, 128), jnp.float32)
    sml_acc = jnp.zeros((tb, 128), jnp.float32)
    for g in range(n_groups):
        sl = slice(g * 128, (g + 1) * 128)
        lg = logits[:, sl]                                          # free 128-aligned view
        pos = row_t == tgtc_ref[:, sl]                              # positives (incl. self)
        ndiag = row_gid != (col_base + g * 128 + lane)              # self column off
        # weight = 1/(count-1) on positives, 1/count elsewhere, 0 on padded columns
        # (r0/r1 are pre-zeroed on padding) and 0 on the self column.
        w = jnp.where(pos, r1_ref[:, sl], r0_ref[:, sl])
        w = jnp.where(ndiag, w, 0.0)
        l_acc = l_acc + jnp.exp(lg - m_new) * w
        sml_acc = sml_acc + jnp.where(jnp.logical_and(pos, ndiag), lg, 0.0)

    l_ref[...] = alpha * l_ref[...] + l_acc
    sml_ref[...] = sml_ref[...] + sml_acc
    m_ref[...] = m_new

    @pl.when(k == nk - 1)
    def _finalize():
        # Single cross-lane (XLU) reduction per row block.
        m_lane = m_ref[...]
        m_row = jnp.max(m_lane, axis=1, keepdims=True)              # (tb, 1)
        l_row = jnp.sum(l_ref[...] * jnp.exp(m_lane - m_row),
                        axis=1, keepdims=True)                      # (tb, 1)
        sml_row = jnp.sum(sml_ref[...], axis=1, keepdims=True)      # (tb, 1)
        den = den_ref[...]                                          # count_i - 1 (0 on pad rows)
        # mean_log_prob_pos_i = [sum(mask*logits) - den_i*(m_i + log(l_i))] / den_i
        log_s = m_row + jnp.log(l_row)
        val = (sml_row - den * log_s) / jnp.maximum(den, 1.0)
        out_ref[...] = jnp.where(den > 0.0, val, 0.0)               # padded rows -> 0


def _round_up(x, m):
    return ((x + m - 1) // m) * m


def _pick_tiles(B, N):
    TB = min(512, _round_up(B, 16))
    # v7x megacore: ensure >= 2 blocks on the "parallel" i axis when B is big
    # enough to split, so both TensorCores get work.
    if B >= 32 and _round_up(B, TB) // TB < 2:
        TB = _round_up((B + 1) // 2, 16)
    TN = min(1024, _round_up(N, 128))
    return TB, TN


@functools.partial(jax.jit, static_argnames=("cls_num",))
def balscl_loss(proto, features, targets, temperature, *, cls_num):
    """Pallas implementation of BalSCL.forward."""
    B, D = features.shape
    C = cls_num
    N = B + C

    targets = targets.astype(jnp.int32)
    targets_all = jnp.concatenate(
        [targets, jnp.arange(C, dtype=jnp.int32)], axis=0)              # (N,)

    # Per-class counts over batch+prototypes, gathered per column.
    batch_cls_count = jnp.zeros((C,), jnp.float32).at[targets_all].add(1.0)
    col_count = batch_cls_count[targets_all]                            # (N,)

    # Weight reciprocals (exact divides on tiny (N,) vectors).  Where a column is a
    # positive for some row its class has count >= 2, so the clamp is inert there.
    r0 = 1.0 / col_count
    r1 = 1.0 / jnp.maximum(col_count - 1.0, 1.0)

    # Per-row positive count den_i = count(class_i) - 1 >= 1: logits-independent,
    # so computed here instead of being accumulated in-kernel.
    den = batch_cls_count[targets] - 1.0                                # (B,)

    inv_t = 1.0 / jnp.asarray(temperature, jnp.float32)

    feats = features.astype(jnp.float32)
    feat_all = jnp.concatenate([feats, proto.astype(jnp.float32)], axis=0)   # (N, D)

    TB, TN = _pick_tiles(B, N)
    Bp = _round_up(B, TB)
    Np = _round_up(N, TN)

    # MXU operands: 1/temperature folded into q before the bf16 cast; feat_all is
    # pre-transposed to (D, Np) so the kernel matmul is canonical (M,K)x(K,N).
    featq = jnp.pad(feats * inv_t, ((0, Bp - B), (0, 0))).astype(jnp.bfloat16)       # (Bp, D)
    featall_t = jnp.pad(feat_all.T, ((0, 0), (0, Np - N))).astype(jnp.bfloat16)      # (D, Np)

    tgt_rows = jnp.pad(targets, (0, Bp - B), constant_values=-2).reshape(Bp, 1)
    den_rows = jnp.pad(den, (0, Bp - B)).reshape(Bp, 1)
    tgt_cols = jnp.pad(targets_all, (0, Np - N), constant_values=-1).reshape(1, Np)
    r0_row = jnp.pad(r0, (0, Np - N)).reshape(1, Np)                    # 0 on padded columns
    r1_row = jnp.pad(r1, (0, Np - N)).reshape(1, Np)                    # 0 on padded columns

    grid = (Bp // TB, Np // TN)

    mlpp = pl.pallas_call(
        _balscl_kernel,
        out_shape=jax.ShapeDtypeStruct((Bp, 1), jnp.float32),
        grid=grid,
        in_specs=[
            pl.BlockSpec((TB, 1), lambda i, k: (i, 0)),   # row classes (int32)
            pl.BlockSpec((TB, 1), lambda i, k: (i, 0)),   # den = count-1 (f32)
            pl.BlockSpec((1, TN), lambda i, k: (0, k)),   # col classes (int32)
            pl.BlockSpec((1, TN), lambda i, k: (0, k)),   # 1/count
            pl.BlockSpec((1, TN), lambda i, k: (0, k)),   # 1/(count-1)
            pl.BlockSpec((TB, D), lambda i, k: (i, 0)),   # q, pre-scaled (bf16)
            pl.BlockSpec((D, TN), lambda i, k: (0, k)),   # feat_all^T (bf16)
        ],
        out_specs=pl.BlockSpec((TB, 1), lambda i, k: (i, 0)),
        scratch_shapes=[
            pltpu.VMEM((TB, 128), jnp.float32),   # per-lane running max m
            pltpu.VMEM((TB, 128), jnp.float32),   # per-lane weighted exp-sum l
            pltpu.VMEM((TB, 128), jnp.float32),   # per-lane sum(mask * logits)
        ],
        compiler_params=pltpu.CompilerParams(
            dimension_semantics=("parallel", "arbitrary"),
            vmem_limit_bytes=48 * 1024 * 1024,    # safe on v7x (64 MiB), ample on v5e/v6e
        ),
    )(tgt_rows, den_rows, tgt_cols, r0_row, r1_row, featq, featall_t)

    # Final scalar reduction over the B valid rows (tiny, done in plain JAX).
    return -jnp.mean(mlpp[:B, 0])


def balscl_loss_ref(proto, features, targets, temperature, *, cls_num,
                    matmul_dtype=jnp.float32, fold_temp=False):
    """Pure-JAX reference mirroring the PyTorch code (for sanity checking)."""
    B, D = features.shape
    C = cls_num
    targets = targets.astype(jnp.int32)
    targets_all = jnp.concatenate([targets, jnp.arange(C, dtype=jnp.int32)])
    batch_cls_count = jnp.sum(jax.nn.one_hot(targets_all, C, dtype=jnp.float32), axis=0)
    mask = (targets[:, None] == targets_all[None, :]).astype(jnp.float32)
    logits_mask = jnp.ones((B, B + C), jnp.float32)
    logits_mask = logits_mask.at[jnp.arange(B), jnp.arange(B)].set(0.0)
    mask = mask * logits_mask
    feat_all = jnp.concatenate([features, proto], axis=0)
    if fold_temp:
        # Matches the kernel's rounding: 1/T folded into q before the low-precision cast.
        q = (features / temperature).astype(matmul_dtype)
        logits = jnp.dot(q, feat_all.T.astype(matmul_dtype),
                         preferred_element_type=jnp.float32)
    else:
        logits = jnp.dot(features.astype(matmul_dtype), feat_all.T.astype(matmul_dtype),
                         preferred_element_type=jnp.float32) / temperature
    logits = logits - jnp.max(logits, axis=1, keepdims=True)
    exp_logits = jnp.exp(logits) * logits_mask
    per_ins_weight = batch_cls_count[targets_all][None, :] - mask
    exp_logits_sum = jnp.sum(exp_logits / per_ins_weight, axis=1, keepdims=True)
    log_prob = logits - jnp.log(exp_logits_sum)
    mean_log_prob_pos = jnp.sum(mask * log_prob, axis=1) / jnp.sum(mask, axis=1)
    return -jnp.mean(mean_log_prob_pos)


if __name__ == "__main__":
    key = jax.random.PRNGKey(0)
    k_feat, k_proto, k_tgt = jax.random.split(key, 3)

    B, D, CLS_NUM = 8, 32, 4
    temperature = 0.07

    features = jax.random.normal(k_feat, (B, D), dtype=jnp.float32)
    features = features / jnp.linalg.norm(features, axis=1, keepdims=True)
    proto = jax.random.normal(k_proto, (CLS_NUM, D), dtype=jnp.float32)
    proto = proto / jnp.linalg.norm(proto, axis=1, keepdims=True)
    targets = jax.random.randint(k_tgt, (B,), 0, CLS_NUM, dtype=jnp.int32)

    loss = balscl_loss(proto, features, targets, temperature, cls_num=CLS_NUM)
    jax.block_until_ready(loss)

    # Tight check against a reference that uses the same bf16 MXU rounding
    # (1/T folded into q before the cast, like the kernel).
    loss_ref_match = balscl_loss_ref(proto, features, targets, temperature,
                                     cls_num=CLS_NUM, matmul_dtype=jnp.bfloat16,
                                     fold_temp=True)
    # Loose sanity check against the full-f32 reference (bf16 cast shifts the
    # loss at roughly the 1e-2 relative level).
    loss_ref_f32 = balscl_loss_ref(proto, features, targets, temperature,
                                   cls_num=CLS_NUM, matmul_dtype=jnp.float32)

    assert bool(jnp.isfinite(loss)), loss
    assert jnp.allclose(loss, loss_ref_match, rtol=5e-3, atol=5e-3), (loss, loss_ref_match)
    assert jnp.allclose(loss, loss_ref_f32, rtol=1e-1, atol=1e-1), (loss, loss_ref_f32)

    print("KERNEL_OK")
</pallas_src>

<mosaic_0001>
module attributes {stable_mosaic.version = 11 : i64} {
  func.func @_balscl_kernel(%arg0: i32, %arg1: i32, %arg2: memref<16x1xi32, #tpu.memory_space<vmem>>, %arg3: memref<16x1xf32, #tpu.memory_space<vmem>>, %arg4: memref<1x128xi32, #tpu.memory_space<vmem>>, %arg5: memref<1x128xf32, #tpu.memory_space<vmem>>, %arg6: memref<1x128xf32, #tpu.memory_space<vmem>>, %arg7: memref<16x32xbf16, #tpu.memory_space<vmem>>, %arg8: memref<32x128xbf16, #tpu.memory_space<vmem>>, %arg9: memref<16x1xf32, #tpu.memory_space<vmem>>, %arg10: memref<16x128xf32, #tpu.memory_space<vmem>>, %arg11: memref<16x128xf32, #tpu.memory_space<vmem>>, %arg12: memref<16x128xf32, #tpu.memory_space<vmem>>) attributes {dimension_semantics = [#tpu.dimension_semantics<parallel>, #tpu.dimension_semantics<arbitrary>], iteration_bounds = array<i64: 1, 1>, scalar_prefetch = 0 : i64, scratch_operands = 3 : i64, tpu.core_type = #tpu.core_type<tc>, window_params = [{transform_indices = @transform_0, window_bounds = array<i64: 16, 1>}, {transform_indices = @transform_1, window_bounds = array<i64: 16, 1>}, {transform_indices = @transform_2, window_bounds = array<i64: 1, 128>}, {transform_indices = @transform_3, window_bounds = array<i64: 1, 128>}, {transform_indices = @transform_4, window_bounds = array<i64: 1, 128>}, {transform_indices = @transform_5, window_bounds = array<i64: 16, 32>}, {transform_indices = @transform_6, window_bounds = array<i64: 32, 128>}, {transform_indices = @transform_7, window_bounds = array<i64: 16, 1>}]} {
    %c0_i32 = arith.constant 0 : i32
    %0 = arith.cmpi eq, %arg1, %c0_i32 : i32
    %1 = arith.extui %0 : i1 to i32
    %c0_i32_0 = arith.constant 0 : i32
    %2 = arith.cmpi ne, %1, %c0_i32_0 : i32
    scf.if %2 {
      %cst_31 = arith.constant 0.000000e+00 : f32
      %57 = vector.broadcast %cst_31 : f32 to vector<16x128xf32>
      %c0_32 = arith.constant 0 : index
      %c0_33 = arith.constant 0 : index
      %58 = vector.load %arg10[%c0_32, %c0_33] : memref<16x128xf32, #tpu.memory_space<vmem>>, vector<16x128xf32>
      tpu.vector_store %arg10[%c0_32, %c0_33], %57 {strides = array<i32>} : memref<16x128xf32, #tpu.memory_space<vmem>>, vector<16x128xf32>,
      %cst_34 = arith.constant 0.000000e+00 : f32
      %59 = vector.broadcast %cst_34 : f32 to vector<16x128xf32>
      %c0_35 = arith.constant 0 : index
      %c0_36 = arith.constant 0 : index
      %60 = vector.load %arg11[%c0_35, %c0_36] : memref<16x128xf32, #tpu.memory_space<vmem>>, vector<16x128xf32>
      tpu.vector_store %arg11[%c0_35, %c0_36], %59 {strides = array<i32>} : memref<16x128xf32, #tpu.memory_space<vmem>>, vector<16x128xf32>,
      %cst_37 = arith.constant 0.000000e+00 : f32
      %61 = vector.broadcast %cst_37 : f32 to vector<16x128xf32>
      %c0_38 = arith.constant 0 : index
      %c0_39 = arith.constant 0 : index
      %62 = vector.load %arg12[%c0_38, %c0_39] : memref<16x128xf32, #tpu.memory_space<vmem>>, vector<16x128xf32>
      tpu.vector_store %arg12[%c0_38, %c0_39], %61 {strides = array<i32>} : memref<16x128xf32, #tpu.memory_space<vmem>>, vector<16x128xf32>,
    } else {
    }
    %c0 = arith.constant 0 : index
    %c0_1 = arith.constant 0 : index
    %3 = vector.load %arg7[%c0, %c0_1] : memref<16x32xbf16, #tpu.memory_space<vmem>>, vector<16x32xbf16>
    %c0_2 = arith.constant 0 : index
    %c0_3 = arith.constant 0 : index
    %4 = vector.load %arg8[%c0_2, %c0_3] : memref<32x128xbf16, #tpu.memory_space<vmem>>, vector<32x128xbf16>
    %cst = arith.constant dense<0.000000e+00> : vector<16x128xf32>
    %5 = tpu.matmul %3, %4, %cst {dimension_numbers = #tpu.dot_dimension_numbers<[1], [0], [0], [1], [0, 0, 1, 1], [], []>} : vector<16x32xbf16>, vector<32x128xbf16>, vector<16x128xf32> -> vector<16x128xf32>
    %c0_4 = arith.constant 0 : index
    %c0_5 = arith.constant 0 : index
    %6 = vector.load %arg2[%c0_4, %c0_5] : memref<16x1xi32, #tpu.memory_space<vmem>>, vector<16x1xi32>
    %c16_i32 = arith.constant 16 : i32
    %7 = arith.muli %arg0, %c16_i32 : i32
    %8 = tpu.iota {dimensions = array<i32: 0>} : vector<16x1xi32>
    %9 = vector.broadcast %7 : i32 to vector<16x1xi32>
    %10 = arith.addi %9, %8 : vector<16x1xi32>
    %11 = tpu.iota {dimensions = array<i32: 1>} : vector<1x128xi32>
    %c128_i32 = arith.constant 128 : i32
    %12 = arith.muli %arg1, %c128_i32 : i32
    %c0_6 = arith.constant 0 : index
    %c0_7 = arith.constant 0 : index
    %13 = vector.load %arg10[%c0_6, %c0_7] : memref<16x128xf32, #tpu.memory_space<vmem>>, vector<16x128xf32>
    %14 = arith.maximumf %13, %5 : vector<16x128xf32>
    %15 = arith.subf %13, %14 : vector<16x128xf32>
    %16 = math.exp %15 : vector<16x128xf32>
    %cst_8 = arith.constant 0.000000e+00 : f32
    %17 = vector.broadcast %cst_8 : f32 to vector<16x128xf32>
    %cst_9 = arith.constant 0.000000e+00 : f32
    %18 = vector.broadcast %cst_9 : f32 to vector<16x128xf32>
    %c0_10 = arith.constant 0 : index
    %c0_11 = arith.constant 0 : index
    %19 = vector.load %arg4[%c0_10, %c0_11] : memref<1x128xi32, #tpu.memory_space<vmem>>, vector<1x128xi32>
    %20 = vector.broadcast %6 : vector<16x1xi32> to vector<16x128xi32>
    %21 = vector.broadcast %19 : vector<1x128xi32> to vector<16x128xi32>
    %22 = arith.cmpi eq, %20, %21 : vector<16x128xi32>
    %c0_i32_12 = arith.constant 0 : i32
    %23 = arith.addi %12, %c0_i32_12 : i32
    %24 = vector.broadcast %23 : i32 to vector<1x128xi32>
    %25 = arith.addi %24, %11 : vector<1x128xi32>
    %26 = vector.broadcast %10 : vector<16x1xi32> to vector<16x128xi32>
    %27 = vector.broadcast %25 : vector<1x128xi32> to vector<16x128xi32>
    %28 = arith.cmpi ne, %26, %27 : vector<16x128xi32>
    %c0_13 = arith.constant 0 : index
    %c0_14 = arith.constant 0 : index
    %29 = vector.load %arg6[%c0_13, %c0_14] : memref<1x128xf32, #tpu.memory_space<vmem>>, vector<1x128xf32>
    %c0_15 = arith.constant 0 : index
    %c0_16 = arith.constant 0 : index
    %30 = vector.load %arg5[%c0_15, %c0_16] : memref<1x128xf32, #tpu.memory_space<vmem>>, vector<1x128xf32>
    %31 = vector.shape_cast %29 : vector<1x128xf32> to vector<1x128xf32>
    %32 = vector.broadcast %31 : vector<1x128xf32> to vector<16x128xf32>
    %33 = vector.shape_cast %30 : vector<1x128xf32> to vector<1x128xf32>
    %34 = vector.broadcast %33 : vector<1x128xf32> to vector<16x128xf32>
    %35 = arith.select %22, %32, %34 : vector<16x128xi1>, vector<16x128xf32>
    %cst_17 = arith.constant 0.000000e+00 : f32
    %36 = vector.broadcast %cst_17 : f32 to vector<16x128xf32>
    %37 = arith.select %28, %35, %36 : vector<16x128xi1>, vector<16x128xf32>
    %38 = arith.subf %5, %14 : vector<16x128xf32>
    %39 = math.exp %38 : vector<16x128xf32>
    %40 = arith.mulf %39, %37 : vector<16x128xf32>
    %41 = arith.addf %17, %40 : vector<16x128xf32>
    %42 = arith.andi %22, %28 : vector<16x128xi1>
    %cst_18 = arith.constant 0.000000e+00 : f32
    %43 = vector.broadcast %cst_18 : f32 to vector<16x128xf32>
    %44 = arith.select %42, %5, %43 : vector<16x128xi1>, vector<16x128xf32>
    %45 = arith.addf %18, %44 : vector<16x128xf32>
    %c0_19 = arith.constant 0 : index
    %c0_20 = arith.constant 0 : index
    %46 = vector.load %arg11[%c0_19, %c0_20] : memref<16x128xf32, #tpu.memory_space<vmem>>, vector<16x128xf32>
    %47 = arith.mulf %16, %46 : vector<16x128xf32>
    %48 = arith.addf %47, %41 : vector<16x128xf32>
    %c0_21 = arith.constant 0 : index
    %c0_22 = arith.constant 0 : index
    %49 = vector.load %arg11[%c0_21, %c0_22] : memref<16x128xf32, #tpu.memory_space<vmem>>, vector<16x128xf32>
    tpu.vector_store %arg11[%c0_21, %c0_22], %48 {strides = array<i32>} : memref<16x128xf32, #tpu.memory_space<vmem>>, vector<16x128xf32>,
    %c0_23 = arith.constant 0 : index
    %c0_24 = arith.constant 0 : index
    %50 = vector.load %arg12[%c0_23, %c0_24] : memref<16x128xf32, #tpu.memory_space<vmem>>, vector<16x128xf32>
    %51 = arith.addf %50, %45 : vector<16x128xf32>
    %c0_25 = arith.constant 0 : index
    %c0_26 = arith.constant 0 : index
    %52 = vector.load %arg12[%c0_25, %c0_26] : memref<16x128xf32, #tpu.memory_space<vmem>>, vector<16x128xf32>
    tpu.vector_store %arg12[%c0_25, %c0_26], %51 {strides = array<i32>} : memref<16x128xf32, #tpu.memory_space<vmem>>, vector<16x128xf32>,
    %c0_27 = arith.constant 0 : index
    %c0_28 = arith.constant 0 : index
    %53 = vector.load %arg10[%c0_27, %c0_28] : memref<16x128xf32, #tpu.memory_space<vmem>>, vector<16x128xf32>
    tpu.vector_store %arg10[%c0_27, %c0_28], %14 {strides = array<i32>} : memref<16x128xf32, #tpu.memory_space<vmem>>, vector<16x128xf32>,
    %c0_i32_29 = arith.constant 0 : i32
    %54 = arith.cmpi eq, %arg1, %c0_i32_29 : i32
    %55 = arith.extui %54 : i1 to i32
    %c0_i32_30 = arith.constant 0 : i32
    %56 = arith.cmpi ne, %55, %c0_i32_30 : i32
    scf.if %56 {
      %c0_31 = arith.constant 0 : index
      %c0_32 = arith.constant 0 : index
      %57 = vector.load %arg10[%c0_31, %c0_32] : memref<16x128xf32, #tpu.memory_space<vmem>>, vector<16x128xf32>
      %cst_33 = arith.constant dense<0xFF800000> : vector<16xf32>
      %58 = vector.multi_reduction <maximumf>, %57, %cst_33 [1] : vector<16x128xf32> to vector<16xf32>
      %59 = vector.shape_cast %58 : vector<16xf32> to vector<16x1xf32>
      %c0_34 = arith.constant 0 : index
      %c0_35 = arith.constant 0 : index
      %60 = vector.load %arg11[%c0_34, %c0_35] : memref<16x128xf32, #tpu.memory_space<vmem>>, vector<16x128xf32>
      %61 = vector.broadcast %59 : vector<16x1xf32> to vector<16x128xf32>
      %62 = arith.subf %57, %61 : vector<16x128xf32>
      %63 = math.exp %62 : vector<16x128xf32>
      %64 = arith.mulf %60, %63 : vector<16x128xf32>
      %cst_36 = arith.constant dense<0.000000e+00> : vector<16xf32>
      %65 = vector.multi_reduction <add>, %64, %cst_36 [1] : vector<16x128xf32> to vector<16xf32>
      %66 = vector.shape_cast %65 : vector<16xf32> to vector<16x1xf32>
      %c0_37 = arith.constant 0 : index
      %c0_38 = arith.constant 0 : index
      %67 = vector.load %arg12[%c0_37, %c0_38] : memref<16x128xf32, #tpu.memory_space<vmem>>, vector<16x128xf32>
      %cst_39 = arith.constant dense<0.000000e+00> : vector<16xf32>
      %68 = vector.multi_reduction <add>, %67, %cst_39 [1] : vector<16x128xf32> to vector<16xf32>
      %69 = vector.shape_cast %68 : vector<16xf32> to vector<16x1xf32>
      %c0_40 = arith.constant 0 : index
      %c0_41 = arith.constant 0 : index
      %70 = vector.load %arg3[%c0_40, %c0_41] : memref<16x1xf32, #tpu.memory_space<vmem>>, vector<16x1xf32>
      %71 = math.log %66 : vector<16x1xf32>
      %72 = arith.addf %59, %71 : vector<16x1xf32>
      %73 = arith.mulf %70, %72 : vector<16x1xf32>
      %74 = arith.subf %69, %73 : vector<16x1xf32>
      %cst_42 = arith.constant 1.000000e+00 : f32
      %75 = vector.broadcast %cst_42 : f32 to vector<16x1xf32>
      %76 = arith.maximumf %70, %75 : vector<16x1xf32>
      %77 = arith.divf %74, %76 : vector<16x1xf32>
      %cst_43 = arith.constant 0.000000e+00 : f32
      %78 = vector.broadcast %cst_43 : f32 to vector<16x1xf32>
      %79 = arith.cmpf ogt, %70, %78 : vector<16x1xf32>
      %cst_44 = arith.constant 0.000000e+00 : f32
      %80 = vector.broadcast %cst_44 : f32 to vector<16x1xf32>
      %81 = arith.select %79, %77, %80 : vector<16x1xi1>, vector<16x1xf32>
      %c0_45 = arith.constant 0 : index
      %c0_46 = arith.constant 0 : index
      %82 = vector.load %arg9[%c0_45, %c0_46] : memref<16x1xf32, #tpu.memory_space<vmem>>, vector<16x1xf32>
      tpu.vector_store %arg9[%c0_45, %c0_46], %81 {strides = array<i32>} : memref<16x1xf32, #tpu.memory_space<vmem>>, vector<16x1xf32>,
    } else {
    }
    return
  }
  func.func @transform_0(%arg0: i32, %arg1: i32) -> (i32, i32) {
    %c0_i32 = arith.constant 0 : i32
    %c0_i32_0 = arith.constant 0 : i32
    return %arg0, %c0_i32 : i32, i32
  }
  func.func @transform_1(%arg0: i32, %arg1: i32) -> (i32, i32) {
    %c0_i32 = arith.constant 0 : i32
    %c0_i32_0 = arith.constant 0 : i32
    return %arg0, %c0_i32 : i32, i32
  }
  func.func @transform_2(%arg0: i32, %arg1: i32) -> (i32, i32) {
    %c0_i32 = arith.constant 0 : i32
    %c0_i32_0 = arith.constant 0 : i32
    return %c0_i32, %arg1 : i32, i32
  }
  func.func @transform_3(%arg0: i32, %arg1: i32) -> (i32, i32) {
    %c0_i32 = arith.constant 0 : i32
    %c0_i32_0 = arith.constant 0 : i32
    return %c0_i32, %arg1 : i32, i32
  }
  func.func @transform_4(%arg0: i32, %arg1: i32) -> (i32, i32) {
    %c0_i32 = arith.constant 0 : i32
    %c0_i32_0 = arith.constant 0 : i32
    return %c0_i32, %arg1 : i32, i32
  }
  func.func @transform_5(%arg0: i32, %arg1: i32) -> (i32, i32) {
    %c0_i32 = arith.constant 0 : i32
    %c0_i32_0 = arith.constant 0 : i32
    return %arg0, %c0_i32 : i32, i32
  }
  func.func @transform_6(%arg0: i32, %arg1: i32) -> (i32, i32) {
    %c0_i32 = arith.constant 0 : i32
    %c0_i32_0 = arith.constant 0 : i32
    return %c0_i32, %arg1 : i32, i32
  }
  func.func @transform_7(%arg0: i32, %arg1: i32) -> (i32, i32) {
    %c0_i32 = arith.constant 0 : i32
    %c0_i32_0 = arith.constant 0 : i32
    return %arg0, %c0_i32 : i32, i32
  }
}

</mosaic_0001>

<bundles_post_ra>
// kernel: balscl_loss.1
= control target key start
LH: loop header
LB: loop body
LE: loop exit
PB: predicated region body
PF: predicated region fallthrough
CT: control target
= control target key end

     0   :  { %v298_v0 = vmov 0.0   ;;  %vm299_vm0 = vmmov 0   ;;  %v300_v2 = vmov 0   ;;  %vm60_vm1 = vcmask 261120   ;;  %s395_s6 = inlined_call_operand.vmem [shape: bf16[32,128], index: 6, kind: input, shape index: {}]   ;;  %s396_s0 = inlined_call_operand.vmem [shape: s32[16,1], index: 0, kind: input, shape index: {}]   ;;  %s397_s5 = inlined_call_operand.vmem [shape: bf16[16,32], index: 5, kind: input, shape index: {}]   ;;  %s398_s2 = inlined_call_operand.vmem [shape: s32[1,128], index: 2, kind: input, shape index: {}]   ;;  %s399_s3 = inlined_call_operand.vmem [shape: f32[1,128], index: 3, kind: input, shape index: {}]   ;;  %s400_s4 = inlined_call_operand.vmem [shape: f32[1,128], index: 4, kind: input, shape index: {}]   ;;  %s401_s1 = inlined_call_operand.vmem [shape: f32[16,1], index: 1, kind: input, shape index: {}]   ;;  %s402_s7 = inlined_call_operand.vmem [shape: f32[16,1], index: 7, kind: output, shape index: {}]  }
   0x1   :  { %262 = vmatprep.subr.bf16.mxu0 %v298_v0  ;;  %v275_v1 = vld [vmem:[%s395_s6] sm:$0xff]   ;;  %266 = vmatprep.mubr.msk.bf16.mxu0 %vm299_vm0, %v298_v0  ;;  %v276_v3 = vld [vmem:[%s395_s6 + $0x8] sm:$0xff]   ;;  %v108_v21 = vlaneseq  ;;  %vm245_vm9 = vcmask 7168  }
   0x2   :  { %273 = vset.pattern.permute.xlu1 %v300_v2  ;;  %274 = vset.pattern.permute.xlu0 %v300_v2  ;;  %v105_v4 = vld [vmem:[%s396_s0] sm:$0xff]  ;;  %v106_v6 = vld [vmem:[%s396_s0 + $0x8] sm:$0xff] }
   0x3   :  { %263 = vmatpush3.bf16.msra.mxu0 %v275_v1  ;;  %129 = vperm.xlu1 %273, %v105_v4   ;;  %v277_v5 = vld [vmem:[%s397_s5] sm:$0xff]   ;;  %v109_v28 = vshrl.u32 %v108_v21, 7  ;;  %v115_v29 = vand.u32 127, %v108_v21  ;;  %v224_v60 = vld [vmem:[%s401_s1 + $0x8] sm:$0xff] }
   0x4   :  { %264 = vmatprep.subr.bf16.mxu0 %v298_v0  ;;  %v256_v23 = vld [vmem:[%s398_s2] ss:$0 sm:$0xff]  ;;  %v236_v61 = vmax.f32 %v224_v60, 1.0  ;;  %vm242_vm10 = vcmp.gt.f32.partialorder %v224_v60, 0.0 }
   0x5   :  { %v257_v25 = vld [vmem:[%s400_s4] ss:$0 sm:$0xff]  ;;  %vm142_vm3 = vcmp.ne.s32.totalorder %v109_v28, %v115_v29  ;;  %v110_v36 = vadd.s32 8, %v109_v28 }
   0x6   :  { %v258_v26 = vld [vmem:[%s399_s3] ss:$0 sm:$0xff] }
   0x7   :  { %265 = vmatpush3.bf16.msra.mxu0 %v276_v3  ;;  %132 = vperm.xlu1 %273, %v106_v6   ;;  %vm143_vm5 = vcmp.ne.s32.totalorder %v110_v36, %v115_v29  ;;  %v223_v57 = vld [vmem:[%s401_s1] sm:$0xff] }
   0x8   :  { %v235_v58 = vmax.f32 %v223_v57, 1.0  ;;  %vm241_vm8 = vcmp.gt.f32.partialorder %v223_v57, 0.0 }
   0xa   :  { %267 = vmatmul.mubr.msk.bf16.vlgmr.msra.gmra.mrb[0].mxu0 %vm60_vm1, %v277_v5 }
  0x82   :  { %v130_v22 = vpop.permute.xlu1 %129 }
  0x83   :  { %vm138_vm2 = vcmp.eq.s32.totalorder %v130_v22, %v256_v23 }
  0x84   :  { %v158_v31 = vsel %vm138_vm2, %v257_v25, %v258_v26  ;;  %vm172_vm6 = vmand %vm138_vm2, %vm142_vm3 }
  0x85   :  { %v160_v38 = vsel %vm142_vm3, %v158_v31, 0.0 }
  0x86   :  { %v133_v32 = vpop.permute.xlu1 %132 }
  0x87   :  { %vm139_vm4 = vcmp.eq.s32.totalorder %v133_v32, %v256_v23 }
  0x88   :  { %v159_v40 = vsel %vm139_vm4, %v257_v25, %v258_v26  ;;  %vm173_vm7 = vmand %vm139_vm4, %vm143_vm5 }
  0x89   :  { %v161_v45 = vsel %vm143_vm5, %v159_v40, 0.0 }
  0xdd   :  { %v356_v7 = vpop.f32.mrb[0].mxu0 }
  0xde   :  { %v119_v8 = vmax.f32 %v356_v7, 0.0  ;;  %v268_v9 = vpop.f32.mrb[1].mxu0  ;;  %v174_v54 = vsel %vm172_vm6, %v356_v7, 0.0 }
  0xdf   :  { %v359_v10 = vpop.f32.mrb[2].mxu0 }
  0xe0   :  { %199 = vmax.xlane.f32.xlu0 %v119_v8  ;;  %v269_v11 = vpop.f32.mrb[3].mxu0  ;;  %v120_v12 = vmax.f32 %v359_v10, 0.0  ;;  %v162_v13 = vsub.f32 %v356_v7, %v119_v8  ;;  %v121_v14 = vsub.f32 0.0, %v119_v8  ;;  %v175_v55 = vsel %vm173_vm7, %v359_v10, 0.0 }
  0xe2   :  { %v164_v15 = vmul.f32 1.442695, %v162_v13  ;;  %v163_v16 = vsub.f32 %v359_v10, %v120_v12  ;;  %v123_v17 = vmul.f32 1.442695, %v121_v14  ;;  %v122_v18 = vsub.f32 0.0, %v120_v12 }
  0xe4   :  { %201 = vmax.xlane.f32.xlu0 %v120_v12  ;;  %278 = vpow2.f32 %v164_v15  ;;  %v166_v19 = vmul.f32 1.442695, %v163_v16  ;;  %v125_v20 = vmul.f32 1.442695, %v122_v18 }
  0xe5   :  { %280 = vpow2.f32 %v123_v17 }
  0xe6   :  { %282 = vpow2.f32 %v166_v19 }
  0xe7   :  { %284 = vpow2.f32 %v125_v20 }
  0xee   :  { %v279_v35 = vpop.eup %278 }
  0xef   :  { %v281_v37 = vpop.eup %280  ;;  %v168_v42 = vmul.f32 %v279_v35, %v160_v38 }
  0xf0   :  { %v283_v41 = vpop.eup %282  ;;  %v180_v43 = vmul.f32 0.0, %v281_v37 }
  0xf1   :  { %v285_v44 = vpop.eup %284  ;;  %v169_v47 = vmul.f32 %v283_v41, %v161_v45 }
  0xf2   :  { %v182_v46 = vadd.f32 %v180_v43, %v168_v42  ;;  %v181_v48 = vmul.f32 0.0, %v285_v44 }
  0xf4   :  { %v183_v51 = vadd.f32 %v181_v48, %v169_v47 }
 0x16d   :  { %v200_v24 = vpop.xlane.xlu0 %199 }
 0x16e   :  { %v205_v27 = vsub.f32 %v119_v8, %v200_v24 }
 0x170   :  { %v207_v30 = vmul.f32 1.442695, %v205_v27 }
 0x171   :  { %v202_v33 = vpop.xlane.xlu0 %201 }
 0x172   :  { %286 = vpow2.f32 %v207_v30  ;;  %v206_v34 = vsub.f32 %v120_v12, %v202_v33 }
 0x174   :  { %v209_v39 = vmul.f32 1.442695, %v206_v34 }
 0x176   :  { %288 = vpow2.f32 %v209_v39 }
 0x17c   :  { %v287_v49 = vpop.eup %286 }
 0x17d   :  { %v211_v50 = vmul.f32 %v287_v49, %v182_v46 }
 0x17f   :  { %213 = vadd.xlane.f32.xlu0 %v211_v50 }
 0x180   :  { %v289_v52 = vpop.eup %288 }
 0x181   :  { %v212_v53 = vmul.f32 %v289_v52, %v183_v51 }
 0x183   :  { %219 = vadd.xlane.f32.xlu0 %v174_v54  ;;  %215 = vadd.xlane.f32.xlu1 %v212_v53 }
 0x187   :  { %221 = vadd.xlane.f32.xlu0 %v175_v55 }
 0x20c   :  { %v214_v56 = vpop.xlane.xlu0 %213 }
 0x20d   :  { %290 = vlog2.f32 %v214_v56 }
 0x210   :  { %v216_v59 = vpop.xlane.xlu1 %215  ;;  %v220_v2 = vpop.xlane.xlu0 %219 }
 0x211   :  { %292 = vlog2.f32 %v216_v59 }
 0x212   :  { %294 = vrcp.f32 %v235_v58 }
 0x213   :  { %296 = vrcp.f32 %v236_v61 }
 0x214   :  { %v222_v11 = vpop.xlane.xlu0 %221 }
 0x217   :  { %v291_v62 = vpop.eup %290 }
 0x218   :  { %v226_v63 = vmul.f32 0.6931472, %v291_v62 }
 0x21a   :  { %v229_v0 = vadd.f32 %v226_v63, %v200_v24 }
 0x21b   :  { %v293_v1 = vpop.eup %292 }
 0x21c   :  { %v231_v3 = vmul.f32 %v229_v0, %v223_v57  ;;  %v228_v4 = vmul.f32 0.6931472, %v293_v1  ;;  %v295_v5 = vpop.eup %294 }
 0x21d   :  { %v297_v10 = vpop.eup %296 }
 0x21e   :  { %v233_v6 = vsub.f32 %v220_v2, %v231_v3  ;;  %v230_v7 = vadd.f32 %v228_v4, %v202_v33 }
 0x220   :  { %v238_v8 = vmul.f32 %v295_v5, %v233_v6  ;;  %v232_v9 = vmul.f32 %v230_v7, %v224_v60 }
 0x222   :  { %v243_v12 = vsel %vm241_vm8, %v238_v8, 0.0  ;;  %v234_v13 = vsub.f32 %v222_v11, %v232_v9 }
 0x223   :  { %246 = vst.msk [vmem:[%s402_s7] sm:$0xff] %vm245_vm9, %v243_v12 }
 0x224   :  { %v240_v14 = vmul.f32 %v297_v10, %v234_v13 }
 0x226   :  { %v244_v15 = vsel %vm242_vm10, %v240_v14, 0.0 }
 0x227   :  { %247 = vst.msk [vmem:[%s402_s7 + $0x8] sm:$0xff] %vm245_vm9, %v244_v15 }

</bundles_post_ra>
